<compile_context>
chip_gen: v5e
topology: v5e:2x2
jax: 0.10.0
libtpu: 0.0.40
codegen_flags: <defaults>
</compile_context>

<pallas_src>
import functools
import math

import jax
import jax.numpy as jnp
from jax.experimental import pallas as pl
from jax.experimental.pallas import tpu as pltpu


def _noam_kernel(step_ref, lr_ref, *, scale, inv_warmup_1p5):
    # step arrives as a single f32 scalar in SMEM.
    step = step_ref[0]
    # Splat to a (1,1) tile; rsqrt is an EUP (vector) op, so keep it on the
    # vector path rather than risking unsupported scalar transcendentals.
    step_v = jnp.full((1, 1), step, dtype=jnp.float32)
    ramp = step_v * jnp.float32(inv_warmup_1p5)       # linear warmup term
    decay = jax.lax.rsqrt(step_v)                     # inverse-sqrt decay term
    lr_ref[...] = jnp.float32(scale) * jnp.minimum(ramp, decay)


def noam_scheme(global_step, *, num_units, init_lr, warmup_steps=4000):
    """Pallas-backed Noam LR schedule. Returns a float32 scalar.

    Note: for global_step == 0 this returns 0.0 (min(0, +inf) * scale), whereas
    the PyTorch reference would divide by zero; callers start at step >= 1.
    """
    # Fold all static constants in Python — only one runtime transcendental.
    scale = float(init_lr) / math.sqrt(float(num_units))
    inv_warmup_1p5 = float(warmup_steps) ** (-1.5)

    step = jnp.asarray(global_step, dtype=jnp.float32).reshape(1)
    kernel = functools.partial(
        _noam_kernel, scale=scale, inv_warmup_1p5=inv_warmup_1p5
    )
    lr = pl.pallas_call(
        kernel,
        out_shape=jax.ShapeDtypeStruct((1, 1), jnp.float32),
        in_specs=[pl.BlockSpec(memory_space=pltpu.SMEM)],
        out_specs=pl.BlockSpec(memory_space=pltpu.VMEM),
        compiler_params=pltpu.CompilerParams(vmem_limit_bytes=1 << 20),
        cost_estimate=pl.CostEstimate(flops=4, transcendentals=1, bytes_accessed=8),
    )(step)
    return lr[0, 0]


def noam_scheme_xla(global_step, *, num_units, init_lr, warmup_steps=4000):
    """Recommended production path: plain jnp ops that XLA fuses for free."""
    step = jnp.asarray(global_step, dtype=jnp.float32)
    scale = float(init_lr) / math.sqrt(float(num_units))
    return scale * jnp.minimum(
        step * float(warmup_steps) ** (-1.5), jax.lax.rsqrt(step)
    )


def _noam_ref(global_step, num_units, init_lr, warmup_steps=4000):
    gs = float(global_step)
    return init_lr * num_units ** (-0.5) * min(
        gs * warmup_steps ** (-1.5), gs ** (-0.5)
    )


if __name__ == "__main__":
    # Module hyperparameters (deterministic, in-script; no checkpoint load).
    num_units = 32          # d_model
    init_lr = 1e-3
    warmup_steps = 4000

    # Deterministic example input: a small positive global_step.
    key = jax.random.PRNGKey(0)
    global_step = jax.random.randint(key, (), minval=1, maxval=10000).astype(
        jnp.float32
    )

    lr = noam_scheme(
        global_step, num_units=num_units, init_lr=init_lr, warmup_steps=warmup_steps
    )
    lr = jax.block_until_ready(lr)

    # Sanity check against the pure-Python reference semantics.
    ref = _noam_ref(float(global_step), num_units, init_lr, warmup_steps)
    assert abs(float(lr) - ref) <= 1e-5 * max(abs(ref), 1e-12), (float(lr), ref)

    print("KERNEL_OK")
</pallas_src>

<mosaic_0001>
module attributes {stable_mosaic.version = 11 : i64} {
  func.func @_noam_kernel(%arg0: memref<1xf32, #tpu.memory_space<smem>>, %arg1: memref<1x1xf32, #tpu.memory_space<vmem>>) attributes {dimension_semantics = [], scalar_prefetch = 0 : i64, scratch_operands = 0 : i64, tpu.core_type = #tpu.core_type<tc>} {
    %c0 = arith.constant 0 : index
    %0 = memref.load %arg0[%c0] : memref<1xf32, #tpu.memory_space<smem>>
    %1 = vector.broadcast %0 : f32 to vector<1x1xf32>
    %cst = arith.constant 3.95284724E-6 : f32
    %2 = vector.broadcast %cst : f32 to vector<1x1xf32>
    %3 = arith.mulf %1, %2 : vector<1x1xf32>
    %4 = math.rsqrt %1 : vector<1x1xf32>
    %5 = arith.minimumf %3, %4 : vector<1x1xf32>
    %cst_0 = arith.constant 1.76776695E-4 : f32
    %6 = vector.broadcast %cst_0 : f32 to vector<1x1xf32>
    %7 = arith.mulf %6, %5 : vector<1x1xf32>
    %c0_1 = arith.constant 0 : index
    %c0_2 = arith.constant 0 : index
    %8 = vector.load %arg1[%c0_1, %c0_2] : memref<1x1xf32, #tpu.memory_space<vmem>>, vector<1x1xf32>
    tpu.vector_store %arg1[%c0_1, %c0_2], %7 {strides = array<i32>} : memref<1x1xf32, #tpu.memory_space<vmem>>, vector<1x1xf32>,
    return
  }
}

</mosaic_0001>

<bundles_post_ra>
// kernel: tpu_custom_call.1
= control target key start
LH: loop header
LB: loop body
LE: loop exit
PB: predicated region body
PF: predicated region fallthrough
CT: control target
= control target key end

     0   :  { %s89_s0 = inlined_call_operand.<no memory space> [shape: f32[1], index: 0, kind: input, shape index: {}]   ;;  %s90_s1 = inlined_call_operand.hbm [shape: f32[1,1], index: 1, kind: output, shape index: {}]  }
   0x1   :  { %v11_v0 = vstv %s89_s0 }
   0x2   :  { %7 = vsyncpa [#allocation4], 0  ;;  %44 = vrsqrt.f32 %v11_v0  ;;  %vm19_vm0 = vweird.f32 %v11_v0  ;;  %v12_v6 = vmul.f32 3.9528472e-06, %v11_v0  ;;  %s72_s8 = smov [#allocation3]   ;;  %s34_s12 = sshll.u32 %s90_s1, 4  ;;  %s35_s12 = int_to_ptr.hbm [resolvable:$true] %s34_s12 }
   0x3   :  { %s32_s9 = sshll.u32 %s72_s8, 4  ;;  %vm25_vm3 = vcmask 0   ;;  %s33_s9 = int_to_ptr.vmem [resolvable:$true] %s32_s9 }
   0x8   :  { %v45_v1 = vpop.eup %44 }
   0x9   :  { %v14_v2 = vmul.f32 %v45_v1, %v11_v0  ;;  %vm20_vm1 = vweird.f32 %v45_v1 }
   0xa   :  { %vm21_vm2 = vmor %vm19_vm0, %vm20_vm1 }
   0xb   :  { %v15_v3 = vmul.f32 %v45_v1, %v14_v2 }
   0xd   :  { %v16_v4 = vmul.f32 0.5, %v15_v3 }
   0xf   :  { %v17_v5 = vsub.f32 1.5, %v16_v4 }
  0x11   :  { %v18_v7 = vmul.f32 %v45_v1, %v17_v5 }
  0x13   :  { %v22_v8 = vsel %vm21_vm2, %v45_v1, %v18_v7 }
  0x14   :  { %v23_v9 = vmin.f32 %v12_v6, %v22_v8 }
  0x16   :  { %v24_v10 = vmul.f32 0.0001767767, %v23_v9 }
  0x18   :  { %26 = vst.msk [vmem:[#allocation3] sm:$0x1] %vm25_vm3, %v24_v10 }
  0x19   :  { %37 = dma.vmem_to_hbm [thread:$0]  %s33_s9, 16, %s35_s12, [#allocation4]  }
  0x1a   :  { %70 = dma.done.wait [#allocation4], 16  }
  0x1b   :  { %71 = vsyncadd [#allocation4], 4294967280 }
  0x1c   :  { %42 = vsyncpa [#allocation4], 1 }

</bundles_post_ra>
